<compile_context>
chip_gen: v5e
topology: v5e:2x2
jax: 0.10.0
libtpu: 0.0.40
codegen_flags: <defaults>
</compile_context>

<pallas_src>
import jax
import jax.numpy as jnp
from jax.experimental import pallas as pl
from jax.experimental.pallas import tpu as pltpu


def _round_up(x, m):
    return ((x + m - 1) // m) * m


def _divisors_desc(n):
    return [d for d in range(n, 0, -1) if n % d == 0]


def _deconv_phase_kernel(x_ref, wx_ref, ws_ref, b_ref, o_ref):
    """One (batch-block, row-block) tile.

    x_ref : (nb, th, W, Cip)   NHWC input tile, channels zero-padded, Cip%128==0
    wx_ref: (Cip, 2*P)         weights applied to x[p, m];
                               lanes [0,P): s==0 phases (r=0 | r=1 | pad),
                               lanes [P,2P): s==1 phases (r=0 | r=1 | pad)
    ws_ref: (Cip, P)           weights applied to x[p, m+1]; s==1 phases only
    b_ref : (1, 2*P) float32   bias replicated per phase block (pad lanes = 0)
    o_ref : (nb, th, W, 2*P)   output tile, phase blocks packed in the lane dim
    """
    nb, th, W, Cip = x_ref.shape
    P = o_ref.shape[-1] // 2
    M = nb * th * W

    # (nb, th, W, Cip) -> (M, Cip) is a pure relabeling because Cip % 128 == 0.
    xf = x_ref[...].reshape(M, Cip)

    # x[p, m+1] with zero fill at m == W-1:
    #   roll the flattened row axis up by one (shift = M-1 == -1 mod M; sublane
    #   rotate on the XLU) and zero the m == W-1 rows with a VPU select.  The
    #   mask also kills the wrap-around row, so there is no cross-row
    #   contamination.  No concatenate / explicit zeros buffer needed.
    rolled = pltpu.roll(xf, M - 1, 0)
    m_idx = jax.lax.broadcasted_iota(
        jnp.int32, (nb, th, W, Cip), 2).reshape(M, Cip)
    xsf = jnp.where(m_idx < W - 1, rolled, jnp.zeros_like(rolled))

    # Two MXU matmuls with f32 accumulation.  The shifted-x matmul is only
    # P lanes wide and feeds only the (128-aligned) s==1 half of the output,
    # so no MACs are spent multiplying explicit zero weight blocks.
    # (For very small Ci one could instead fuse into a single K=2*Cip matmul;
    #  that is mutually exclusive with the zero-block removal and loses for
    #  the typical PixelCNN++ nr_filters=160 case, so it is not done here.)
    acc = jnp.dot(xf, wx_ref[...], preferred_element_type=jnp.float32)   # (M, 2P)
    acc_s1 = acc[:, P:] + jnp.dot(xsf, ws_ref[...],
                                  preferred_element_type=jnp.float32)    # (M, P)
    out = jnp.concatenate([acc[:, :P], acc_s1], axis=-1) + b_ref[...]
    o_ref[...] = out.reshape(nb, th, W, 2 * P).astype(o_ref.dtype)


def _choose_tiles(N, H, W, Cip, P, itemsize, budget_bytes, fixed_bytes):
    """Pick (nb, th) divisors of (N, H) so the per-step VMEM working set stays
    under budget and the grid keeps at least a few programs (megacore/pipeline).
    """
    row = (2 * W * Cip * itemsize        # streamed x tile, double buffered
           + 2 * W * 2 * P * itemsize    # streamed out tile, double buffered
           + 2 * W * Cip * itemsize      # rolled + masked-shift temporaries
           + 3 * W * P * 4)              # f32 accumulators (2P + P wide)
    avail = max(budget_bytes - fixed_bytes, row)   # always allow >= 1 row
    th = next((d for d in _divisors_desc(H) if d * row <= avail), 1)
    nb = next((d for d in _divisors_desc(N) if d * th * row <= avail), 1)
    # v7x has 2 TensorCores per chip and the pipeline needs a few steps to
    # hide DMA: never collapse to a single grid program if we can split.
    target = min(4, N * H)
    while (N // nb) * (H // th) < target:
        if nb > 1:
            nb = next(d for d in _divisors_desc(N) if d < nb)
        elif th > 1:
            th = next(d for d in _divisors_desc(H) if d < th)
        else:
            break
    return nb, th, row


def down_shifted_deconv2d_pallas(x_nchw, v, g, b, *, filter_size=(2, 3),
                                 stride=(2, 2), output_padding=1,
                                 vmem_budget_bytes=16 * 1024 * 1024):
    """Forward pass of down_shifted_deconv2d (weight_norm ConvTranspose2d + crop).

    x_nchw : (N, Ci, H, W)     PyTorch-layout input
    v      : (Ci, Co, KH, KW)  weight_norm direction (ConvTranspose2d layout)
    g      : (Ci,)             weight_norm magnitude (wn default dim=0)
    b      : (Co,)             deconv bias
    Returns (N, Co, 2*H, 2*W), same dtype as x.  Matmuls run in x.dtype
    (f32 weights are rounded to bf16 when x is bf16 -- small, expected
    deviation from PyTorch's f32 weight path), accumulation in float32.
    """
    KH, KW = filter_size
    sh, sw = stride
    if (KH, KW) != (2, 3) or (sh, sw) != (2, 2) or output_padding != 1:
        # TODO(synk): generalize the phase decomposition; PixelCNN++ only uses
        # (2,3)/(2,2)/1 and the module default stride=(1,1) is rejected by
        # PyTorch itself (output_padding must be < stride).
        raise NotImplementedError(
            "only filter_size=(2,3), stride=(2,2), output_padding=1 supported")

    N, Ci, H, W = x_nchw.shape
    Co = v.shape[1]
    cdt = x_nchw.dtype
    isz = x_nchw.dtype.itemsize

    Cip = _round_up(Ci, 128)          # padded contraction (lane-aligned K)
    P = _round_up(2 * Co, 128)        # padded width of one s-phase pair block

    # weight_norm (dim=0 -> per input channel for ConvTranspose2d weights).
    vf = v.astype(jnp.float32)
    norm = jnp.sqrt(jnp.sum(vf * vf, axis=(1, 2, 3), keepdims=True))
    w = (g.reshape(Ci, 1, 1, 1).astype(jnp.float32) / norm) * vf  # (Ci,Co,KH,KW)

    def _pack(cols):                  # [(Ci, Co), (Ci, Co)] -> (Cip, P)
        blk = jnp.concatenate(cols, axis=1)
        return jnp.pad(blk, ((0, Cip - Ci), (0, P - 2 * Co)))

    # Phase packing: lanes [0,P) hold the s==0 phases (r=0 | r=1), lanes
    # [P,2P) hold the s==1 phases.  The shifted-x weights (kw=0 taps) only
    # exist for s==1, so ws is P wide -- no zero blocks, no wasted MACs.
    wx = jnp.concatenate(
        [_pack([w[:, :, 0, 1], w[:, :, 1, 1]]),      # s == 0, x[p, m]
         _pack([w[:, :, 0, 2], w[:, :, 1, 2]])],     # s == 1, x[p, m]
        axis=1).astype(cdt)                          # (Cip, 2P)
    ws = _pack([w[:, :, 0, 0], w[:, :, 1, 0]]).astype(cdt)   # (Cip, P)

    bb = jnp.pad(jnp.tile(b.astype(jnp.float32), 2), (0, P - 2 * Co))
    b_big = jnp.concatenate([bb, bb]).reshape(1, 2 * P)

    # Single wrapper layout pass: NCHW -> NHWC plus channel zero-pad (fused).
    x_nhwc = jnp.transpose(x_nchw, (0, 2, 3, 1))
    if Cip != Ci:
        x_nhwc = jnp.pad(x_nhwc, ((0, 0), (0, 0), (0, 0), (0, Cip - Ci)))

    fixed = 2 * (Cip * 2 * P + Cip * P) * isz + 2 * 2 * P * 4  # weights + bias
    nb, th, row = _choose_tiles(N, H, W, Cip, P, isz, vmem_budget_bytes, fixed)
    grid = (N // nb, H // th)
    vmem_limit = max(32 * 1024 * 1024, int(1.25 * (fixed + nb * th * row)))

    buf = pl.pallas_call(
        _deconv_phase_kernel,
        out_shape=jax.ShapeDtypeStruct((N, H, W, 2 * P), cdt),
        grid_spec=pltpu.PrefetchScalarGridSpec(
            num_scalar_prefetch=0,
            grid=grid,
            in_specs=[
                # x is the only streamed input; set pipeline_mode=pl.Buffered(3)
                # here if profiling shows exposed DMA at small Ci.
                pl.BlockSpec((nb, th, W, Cip), lambda bi, hi: (bi, hi, 0, 0)),
                pl.BlockSpec((Cip, 2 * P), lambda bi, hi: (0, 0)),
                pl.BlockSpec((Cip, P), lambda bi, hi: (0, 0)),
                pl.BlockSpec((1, 2 * P), lambda bi, hi: (0, 0)),
            ],
            out_specs=pl.BlockSpec((nb, th, W, 2 * P),
                                   lambda bi, hi: (bi, hi, 0, 0)),
        ),
        compiler_params=pltpu.CompilerParams(
            dimension_semantics=("parallel", "parallel"),
            vmem_limit_bytes=vmem_limit),
    )(x_nhwc, wx, ws, b_big)

    # buf[n, p, m, s*P + r*Co + co] == out[n, co, 2p+r, 2m+s].
    # Un-interleave the phases inside the single NCHW transpose (the padded
    # lanes are stripped by the slices, which fuse into this pass).
    blk0 = buf[..., :2 * Co].reshape(N, H, W, 2, Co)            # s = 0
    blk1 = buf[..., P:P + 2 * Co].reshape(N, H, W, 2, Co)       # s = 1
    st = jnp.stack([blk0, blk1], axis=4)                        # (n,p,m,r,s,co)
    out = jnp.transpose(st, (0, 5, 1, 3, 2, 4))                 # (n,co,p,r,m,s)
    return out.reshape(N, Co, 2 * H, 2 * W)


def _reference(x, v, g, b, filter_size=(2, 3), stride=(2, 2), output_padding=1):
    """Pure-JAX reference: ConvTranspose2d via lhs-dilated conv, then crop."""
    KH, KW = filter_size
    sh, sw = stride
    Ci = v.shape[0]
    vf = v.astype(jnp.float32)
    norm = jnp.sqrt(jnp.sum(vf * vf, axis=(1, 2, 3), keepdims=True))
    w = (g.reshape(Ci, 1, 1, 1).astype(jnp.float32) / norm) * vf  # (Ci,Co,KH,KW)
    w_flip = jnp.flip(jnp.transpose(w, (1, 0, 2, 3)), axis=(2, 3))  # (Co,Ci,KH,KW)
    y = jax.lax.conv_general_dilated(
        x.astype(jnp.float32), w_flip, window_strides=(1, 1),
        padding=((KH - 1, KH - 1 + output_padding),
                 (KW - 1, KW - 1 + output_padding)),
        lhs_dilation=(sh, sw),
        dimension_numbers=("NCHW", "OIHW", "NCHW"))
    y = y + b.reshape(1, -1, 1, 1).astype(jnp.float32)
    H_out, W_out = y.shape[2], y.shape[3]
    c = (KW - 1) // 2
    return y[:, :, :H_out - KH + 1, c:W_out - c]


if __name__ == "__main__":
    key = jax.random.PRNGKey(0)
    k_x, k_v, k_g, k_b = jax.random.split(key, 4)

    N, Ci, H, W = 2, 4, 16, 16
    Co = 8
    KH, KW = 2, 3

    x = jax.random.normal(k_x, (N, Ci, H, W), dtype=jnp.float32)
    # ConvTranspose2d weight layout: (in_channels, out_channels, KH, KW);
    # weight_norm(dim=0) magnitude g has shape (in_channels,).
    v = jax.random.normal(k_v, (Ci, Co, KH, KW), dtype=jnp.float32) * 0.1
    g = jax.random.uniform(k_g, (Ci,), jnp.float32, 0.5, 1.5)
    b = jax.random.normal(k_b, (Co,), dtype=jnp.float32) * 0.01

    out = down_shifted_deconv2d_pallas(x, v, g, b, filter_size=(KH, KW),
                                       stride=(2, 2), output_padding=1)
    out = jax.block_until_ready(out)

    ref = _reference(x, v, g, b, filter_size=(KH, KW), stride=(2, 2),
                     output_padding=1)
    assert out.shape == (N, Co, 2 * H, 2 * W), out.shape
    assert ref.shape == out.shape, (ref.shape, out.shape)
    assert jnp.allclose(out, ref, atol=1e-4, rtol=1e-4), \
        float(jnp.max(jnp.abs(out - ref)))

    print("KERNEL_OK")
</pallas_src>

<mosaic_0001>
module attributes {stable_mosaic.version = 11 : i64} {
  func.func @_deconv_phase_kernel(%arg0: i32, %arg1: i32, %arg2: memref<1x8x16x128xf32, #tpu.memory_space<vmem>>, %arg3: memref<128x256xf32, #tpu.memory_space<vmem>>, %arg4: memref<128x128xf32, #tpu.memory_space<vmem>>, %arg5: memref<1x256xf32, #tpu.memory_space<vmem>>, %arg6: memref<1x8x16x256xf32, #tpu.memory_space<vmem>>) attributes {dimension_semantics = [#tpu.dimension_semantics<parallel>, #tpu.dimension_semantics<parallel>], iteration_bounds = array<i64: 2, 2>, scalar_prefetch = 0 : i64, scratch_operands = 0 : i64, tpu.core_type = #tpu.core_type<tc>, window_params = [{transform_indices = @transform_0, window_bounds = array<i64: 1, 8, 16, 128>}, {pipeline_mode = #tpu.pipeline_mode<synchronous>, transform_indices = @transform_1, window_bounds = array<i64: 128, 256>}, {pipeline_mode = #tpu.pipeline_mode<synchronous>, transform_indices = @transform_2, window_bounds = array<i64: 128, 128>}, {pipeline_mode = #tpu.pipeline_mode<synchronous>, transform_indices = @transform_3, window_bounds = array<i64: 1, 256>}, {transform_indices = @transform_4, window_bounds = array<i64: 1, 8, 16, 256>}]} {
    %c0 = arith.constant 0 : index
    %c0_0 = arith.constant 0 : index
    %c0_1 = arith.constant 0 : index
    %c0_2 = arith.constant 0 : index
    %0 = vector.load %arg2[%c0, %c0_0, %c0_1, %c0_2] : memref<1x8x16x128xf32, #tpu.memory_space<vmem>>, vector<1x8x16x128xf32>
    %1 = vector.shape_cast %0 : vector<1x8x16x128xf32> to vector<128x128xf32>
    %c127_i32 = arith.constant 127 : i32
    %2 = tpu.dynamic_rotate %1 by %c127_i32 dim 0 : vector<128x128xf32>, i32 -> vector<128x128xf32>
    %3 = tpu.iota {dimensions = array<i32: 2>} : vector<1x8x16x128xi32>
    %4 = vector.shape_cast %3 : vector<1x8x16x128xi32> to vector<128x128xi32>
    %c15_i32 = arith.constant 15 : i32
    %5 = vector.broadcast %c15_i32 : i32 to vector<128x128xi32>
    %6 = arith.cmpi slt, %4, %5 : vector<128x128xi32>
    %cst = arith.constant 0.000000e+00 : f32
    %7 = vector.broadcast %cst : f32 to vector<128x128xf32>
    %8 = arith.select %6, %2, %7 : vector<128x128xi1>, vector<128x128xf32>
    %c0_3 = arith.constant 0 : index
    %c0_4 = arith.constant 0 : index
    %9 = vector.load %arg3[%c0_3, %c0_4] : memref<128x256xf32, #tpu.memory_space<vmem>>, vector<128x256xf32>
    %cst_5 = arith.constant dense<0.000000e+00> : vector<128x256xf32>
    %10 = tpu.matmul %1, %9, %cst_5 {dimension_numbers = #tpu.dot_dimension_numbers<[1], [0], [0], [1], [0, 0, 1, 1], [], []>} : vector<128x128xf32>, vector<128x256xf32>, vector<128x256xf32> -> vector<128x256xf32>
    %11 = vector.extract_strided_slice %10 {offsets = [0, 128], sizes = [128, 128], strides = [1, 1]} : vector<128x256xf32> to vector<128x128xf32>
    %c0_6 = arith.constant 0 : index
    %c0_7 = arith.constant 0 : index
    %12 = vector.load %arg4[%c0_6, %c0_7] : memref<128x128xf32, #tpu.memory_space<vmem>>, vector<128x128xf32>
    %cst_8 = arith.constant dense<0.000000e+00> : vector<128x128xf32>
    %13 = tpu.matmul %8, %12, %cst_8 {dimension_numbers = #tpu.dot_dimension_numbers<[1], [0], [0], [1], [0, 0, 1, 1], [], []>} : vector<128x128xf32>, vector<128x128xf32>, vector<128x128xf32> -> vector<128x128xf32>
    %14 = arith.addf %11, %13 : vector<128x128xf32>
    %15 = vector.extract_strided_slice %10 {offsets = [0, 0], sizes = [128, 128], strides = [1, 1]} : vector<128x256xf32> to vector<128x128xf32>
    %16 = tpu.concatenate %15, %14 in 1 : vector<128x128xf32>, vector<128x128xf32> -> vector<128x256xf32>
    %c0_9 = arith.constant 0 : index
    %c0_10 = arith.constant 0 : index
    %17 = vector.load %arg5[%c0_9, %c0_10] : memref<1x256xf32, #tpu.memory_space<vmem>>, vector<1x256xf32>
    %18 = vector.broadcast %17 : vector<1x256xf32> to vector<128x256xf32>
    %19 = arith.addf %16, %18 : vector<128x256xf32>
    %20 = vector.shape_cast %19 : vector<128x256xf32> to vector<1x8x16x256xf32>
    %c0_11 = arith.constant 0 : index
    %c0_12 = arith.constant 0 : index
    %c0_13 = arith.constant 0 : index
    %c0_14 = arith.constant 0 : index
    %21 = vector.load %arg6[%c0_11, %c0_12, %c0_13, %c0_14] : memref<1x8x16x256xf32, #tpu.memory_space<vmem>>, vector<1x8x16x256xf32>
    tpu.vector_store %arg6[%c0_11, %c0_12, %c0_13, %c0_14], %20 {strides = array<i32>} : memref<1x8x16x256xf32, #tpu.memory_space<vmem>>, vector<1x8x16x256xf32>,
    return
  }
  func.func @transform_0(%arg0: i32, %arg1: i32) -> (i32, i32, i32, i32) {
    %c0_i32 = arith.constant 0 : i32
    %c0_i32_0 = arith.constant 0 : i32
    %c0_i32_1 = arith.constant 0 : i32
    return %arg0, %arg1, %c0_i32, %c0_i32_0 : i32, i32, i32, i32
  }
  func.func @transform_1(%arg0: i32, %arg1: i32) -> (i32, i32) {
    %c0_i32 = arith.constant 0 : i32
    %c0_i32_0 = arith.constant 0 : i32
    %c0_i32_1 = arith.constant 0 : i32
    return %c0_i32, %c0_i32_0 : i32, i32
  }
  func.func @transform_2(%arg0: i32, %arg1: i32) -> (i32, i32) {
    %c0_i32 = arith.constant 0 : i32
    %c0_i32_0 = arith.constant 0 : i32
    %c0_i32_1 = arith.constant 0 : i32
    return %c0_i32, %c0_i32_0 : i32, i32
  }
  func.func @transform_3(%arg0: i32, %arg1: i32) -> (i32, i32) {
    %c0_i32 = arith.constant 0 : i32
    %c0_i32_0 = arith.constant 0 : i32
    %c0_i32_1 = arith.constant 0 : i32
    return %c0_i32, %c0_i32_0 : i32, i32
  }
  func.func @transform_4(%arg0: i32, %arg1: i32) -> (i32, i32, i32, i32) {
    %c0_i32 = arith.constant 0 : i32
    %c0_i32_0 = arith.constant 0 : i32
    %c0_i32_1 = arith.constant 0 : i32
    return %arg0, %arg1, %c0_i32, %c0_i32_0 : i32, i32, i32, i32
  }
}

</mosaic_0001>

<bundles_post_ra>
// kernel: tpu_custom_call.1
= control target key start
LH: loop header
LB: loop body
LE: loop exit
PB: predicated region body
PF: predicated region fallthrough
CT: control target
= control target key end

     0   :  { %s1687_s0 = inlined_call_operand.hbm [shape: f32[2,16,16,128], index: 0, kind: input, shape index: {}]   ;;  %s1688_s1 = inlined_call_operand.hbm [shape: f32[128,256], index: 1, kind: input, shape index: {}]   ;;  %s1689_s2 = inlined_call_operand.hbm [shape: f32[128,128], index: 2, kind: input, shape index: {}]   ;;  %s1690_s3 = inlined_call_operand.vmem [shape: f32[1,256], index: 3, kind: input, shape index: {}]   ;;  %s1691_s4 = inlined_call_operand.hbm [shape: f32[2,16,16,256], index: 4, kind: output, shape index: {}]  }
   0x1   :  { %1700 = sst [smem:[#allocation16_spill]] %s1688_s1 }
   0x2   :  { %1701 = sst [smem:[#allocation17_spill]] %s1689_s2 }
   0x3   :  { %1702 = sst [smem:[#allocation18_spill]] %s1691_s4 }
   0x4   :  { %9 = vsyncpa [#allocation3], 0 }
   0x5   :  { %11 = vsyncpa [#allocation3 + $0x1], 0 }
   0x6   :  { %12 = vsyncpa [#allocation6], 0 }
   0x7   :  { %13 = vsyncpa [#allocation4], 0 }
   0x8   :  { %15 = vsyncpa [#allocation4 + $0x1], 0  ;;  %s1212_s15 = smov 0   ;;  %s1214_s16 = smov 0  }
   0x9   :  { %s1216_s17 = smov 0   ;;  %s1218_s18 = smov 0  }
   0xa   :  { %s1220_s19 = smov 0   ;;  %s1222_s20 = smov 0  }
   0xb   :  { %s1224_s21 = smov 0   ;;  %s1226_s22 = smov 0  }
   0xc LB: > { %1703 = sst [smem:[#allocation12_spill]] %s1149_s15  ;;  %s799_s23 = sadd.s32 4294967295, %s1177_s22   ;;  %s1177_s22 = sphi %s1226_s22, %s21_s22   ;;  %s1173_s21 = sphi %s1224_s21, %s1729_s21   ;;  %s1169_s20 = sphi %s1222_s20, %s1728_s20   ;;  %s1165_s19 = sphi %s1220_s19, %s1727_s19   ;;  %s1161_s18 = sphi %s1218_s18, %s1726_s18   ;;  %s1157_s17 = sphi %s1216_s17, %s1725_s17   ;;  %s1153_s16 = sphi %s1214_s16, %s1724_s16   ;;  %s1149_s15 = sphi %s1212_s15, %s1723_s15  }
   0xd   : > { %s800_s24 = sadd.s32 4294967294, %s1177_s22   ;;  %p55_p0 = scmp.ne.s32.totalorder %s1153_s16, %s1149_s15 }
   0xe   : > { %p1256_p1 = scmp.eq.s32.totalorder %s799_s23, 0  ;;  %p1260_p2 = scmp.eq.s32.totalorder %s799_s23, 3 }
   0xf   : > { %p150_p3 = scmp.eq.s32.totalorder %s800_s24, 3  ;;  %p801_p5 = scmp.ge.s32.totalorder %s1177_s22, 1 }
  0x10   : > { %p1266_p4 = por %p1256_p1, %p55_p0  ;;  %p157_p7 = scmp.lt.s32.totalorder %s1177_s22, 5 }
  0x11   : > { %p1271_p6 = por %p150_p3, %p55_p0  ;;  %s1709_s1 = sld [smem:[#allocation16_spill]] }
  0x12   : > { %p1279_p8 = pnand %p801_p5, %p157_p7  ;;  %s1179_s7 = smov [#allocation5]  }
  0x13   : > { %s1707_s28 = scalar_select %p1271_p6, 1, 0 }
  0x14   : > { %p892_p9 = pneg %p1279_p8  ;;  %s170_s8 = sshll.u32 %s1179_s7, 4  ;;  %s171_s8 = int_to_ptr.vmem [resolvable:$true] %s170_s8 }
  0x15   : > { %1708 = sst [smem:[#allocation13_spill]] %s1707_s28  ;;  %s1180_s12 = smov 256  }
  0x16   : > { %p893_p10 = pnand %p892_p9, %p1256_p1  ;;  %s1711_s2 = sld [smem:[#allocation17_spill]] }
  0x17   : > { %s168_s5 = sshll.u32 %s1709_s1, 4  ;;  %s1181_s13 = smov 16   ;;  %s169_s5 = int_to_ptr.hbm [resolvable:$true] %s168_s5 }
  0x18   : > { %895 = dma.hbm_to_vmem [thread:$0]  (!%p893_p10), %s169_s5, 4096, %s171_s8, [#allocation6], %s1180_s12, %s1180_s12, %s1181_s13  }
  0x19   : > { %s1182_s14 = smov [#allocation7]   ;;  %s1692_s24 = smov 128  }
  0x1a   : > { %s184_s23 = sshll.u32 %s1182_s14, 4  ;;  %s1693_s29 = smov 8   ;;  %s185_s23 = int_to_ptr.vmem [resolvable:$true] %s184_s23 }
  0x1b   : > { %s30_s30 = sadd.s32 1, %s1169_s20  ;;  %s33_s7 = sadd.s32 1, %s1173_s21 }
  0x1c   : > { %s182_s11 = sshll.u32 %s1711_s2, 4  ;;  %p31_p11 = scmp.ge.s32.totalorder %s30_s30, 2  ;;  %s183_s11 = int_to_ptr.hbm [resolvable:$true] %s182_s11 }
  0x1d   : > { %898 = dma.hbm_to_vmem [thread:$0]  (!%p893_p10), %s183_s11, 2048, %s185_s23, [#allocation6], %s1692_s24, %s1692_s24, %s1693_s29  }
  0x1e   : > { %s42_s9 = sadd.s32 1, %s1157_s17  ;;  %p49_p12 = scmp.ne.s32.totalorder %s1157_s17, %s1153_s16 }
  0x1f   : > { %p50_p13 = scmp.eq.s32.totalorder %s1177_s22, 0  ;;  %s1731_s30 = smov (%p31_p11, %s30_s30), 0 }
  0x20   : > { %1712 = sst [smem:[#allocation14_spill]] %s1731_s30  ;;  %s1733_s7 = smov (!%p31_p11, %s33_s7), %s1173_s21 }
  0x21   : > { %s38_s5 = ssub.s32 %s1169_s20, %s1731_s30  ;;  %p1304_p0 = por %p50_p13, %p49_p12 }
  0x22   : > { %p35_p3 = scmp.ge.s32.totalorder %s1733_s7, 2  ;;  %p1310_p5 = por %p1260_p2, %p49_p12 }
  0x23   : > { %p909_p7 = scmp.lt.s32.totalorder %s1177_s22, 4  ;;  %s201_s11 = sand.u32 1, %s1157_s17  }
  0x24   : > { %s1714_s10 = scalar_select %p1310_p5, 1, 0 }
  0x25   : > { %s1735_s7 = smov (%p35_p3, %s1733_s7), 0  ;;  %s805_s12 = sshll.u32 %s201_s11, 7 }
  0x26   : > { %1715 = sst [smem:[#allocation15_spill]] %s1714_s10  ;;  %s37_s13 = ssub.s32 %s1173_s21, %s1735_s7 }
  0x27   : > { %s39_s14 = sor.u32 %s38_s5, %s37_s13  ;;  %s830_s23 = sshll.u32 %s1169_s20, 4 }
  0x28   : > { %p40_p9 = scmp.eq.s32.totalorder %s39_s14, 0  ;;  %s808_s24 = sshll.u32 %s1173_s21, 5 }
  0x29   : > { %s211_s29 = sadd.s32 %s830_s23, %s808_s24  ;;  %s205_s1 = scalar_lea.vmem [#allocation2], %s805_s12 }
  0x2a   : > { %s216_s26 = sshll.u32 %s205_s1, 4  ;;  %s809_s30 = sshll.u32 %s211_s29, 3  ;;  %s217_s26 = int_to_ptr.vmem [resolvable:$true] %s216_s26 }
  0x2b   : > { %s1323_s2 = scalar_select %p40_p9, %s1157_s17, %s42_s9  }
  0x2c   : > { %s213_s10 = scalar_lea.hbm %s1687_s0, %s809_s30  ;;  %p900_p2 = pnand %p909_p7, %p1304_p0 }
  0x2d   : > { %s214_s4 = sshll.u32 %s213_s10, 4  ;;  %s202_s5 = scalar_lea.sflag [#allocation3], %s201_s11  ;;  %s215_s4 = int_to_ptr.hbm [resolvable:$true] %s214_s4 }
  0x2e   : > { %s1716_s13 = smov 8   ;;  %s1717_s14 = smov 128  }
  0x2f   : > { %902 = dma.hbm_to_vmem [thread:$0]  (!%p900_p2), %s215_s4, 2048, %s217_s26, %s202_s5, %s1717_s14, %s1717_s14, %s1716_s13  }
  0x30   : > { %228 = sbr.rel (%p1279_p8) target bundleno = 317 (0x13d), region = 36  ;;  %s1338_s1 = sand.u32 (!%p1279_p8), 1, %s1153_s16  }
  0x31   : > { %s811_s15 = sshll.u32 (!%p1279_p8), %s1338_s1, 7  ;;  %s231_s28 = scalar_lea.sflag (!%p1279_p8), [#allocation3], %s1338_s1 }
  0x32   : > { %s1342_s24 = scalar_lea.vmem (!%p1279_p8), [#allocation2], %s811_s15 }
  0x35   : > { %1136 = dma.done.wait (%p1266_p4), %s231_s28, 2048  }
  0x36   : > { %1138 = vsyncadd (%p1266_p4), %s231_s28, 4294965248 }
  0x37   : > { %1140 = dma.done.wait (%p1256_p1), [#allocation6], 6144  }
  0x38   : > { %1142 = vsyncadd (%p1256_p1), [#allocation6], 4294961152  ;;  %v372_v0 = vld [vmem:[#allocation5 + $0xf0] sm:$0xff]  ;;  %v1352_v1 = vld [vmem:[#allocation7 + $0x78] sm:$0xff]  ;;  %v304_v31 = vlaneseq  ;;  %s814_s27 = sshll.u32 %s1338_s1, 8  ;;  %s831_s29 = sshll.u32 %s1161_s18, 5 }
  0x39   : > { %v370_v2 = vld [vmem:[#allocation5 + $0xe0] sm:$0xff]  ;;  %832 = vmatpush.msra.mxu3 %v372_v0  ;;  %520 = vmatpush.msra.mxu2 %v1352_v1  ;;  %v1355_v3 = vld [vmem:[#allocation7 + $0x70] sm:$0xff]  ;;  %v1357_v5 = vld [vmem:[#allocation7 + $0x68] sm:$0xff]  ;;  %s1578_s6 = scalar_lea.vmem [#allocation8], %s814_s27  ;;  %s826_s30 = sshll.u32 %s1165_s19, 6 }
  0x3a   : > { %v368_v4 = vld [vmem:[#allocation5 + $0xd0] sm:$0xff]  ;;  %v1359_v6 = vld [vmem:[#allocation5 + $0xf8] sm:$0xff]  ;;  %374 = vmatpush.msra.mxu0 %v372_v0  ;;  %v1362_v7 = vld [vmem:[#allocation5 + $0xe8] sm:$0xff]  ;;  %v1425_v40 = vshrl.u32 %v304_v31, 7  ;;  %s684_s9 = sadd.s32 %s831_s29, %s826_s30  ;;  %s1718_s10 = sld [smem:[#allocation18_spill]] }
  0x3b   : > { %833 = vmatpush.msra.mxu3 %v370_v2  ;;  %521 = vmatpush.msra.mxu2 %v1355_v3  ;;  %v366_v8 = vld [vmem:[#allocation5 + $0xc0] sm:$0xff]  ;;  %v1368_v10 = vld [vmem:[#allocation5 + $0xd8] sm:$0xff]  ;;  %v364_v11 = vld [vmem:[#allocation5 + $0xb0] sm:$0xff]  ;;  %s827_s8 = sshll.u32 %s684_s9, 3  ;;  %s687_s12 = sshll.u32 %s1578_s6, 4  ;;  %s688_s12 = int_to_ptr.vmem [resolvable:$true] %s687_s12 }
  0x3c   : > { %439 = vmatpush.msra.mxu1 %v1359_v6  ;;  %v1365_v9 = vld [vmem:[#allocation7 + $0x60] sm:$0xff]  ;;  %375 = vmatpush.msra.mxu0 %v370_v2  ;;  %v1371_v12 = vld [vmem:[#allocation7 + $0x58] sm:$0xff]  ;;  %v1374_v13 = vld [vmem:[#allocation5 + $0xc8] sm:$0xff]  ;;  %vm306_vm0 = vcmp.lt.s32.totalorder %v1425_v40, 7  ;;  %v1458_v58 = vadd.s32 8, %v1425_v40  ;;  %s672_s5 = scalar_lea.sflag [#allocation4], %s1338_s1 }
  0x3d   : > { %834 = vmatpush.msra.mxu3 %v368_v4  ;;  %522 = vmatpush.msra.mxu2 %v1357_v5  ;;  %v362_v14 = vld [vmem:[#allocation5 + $0xa0] sm:$0xff]  ;;  %v1377_v15 = vld [vmem:[#allocation7 + $0x50] sm:$0xff]  ;;  %v1380_v16 = vld [vmem:[#allocation5 + $0xb8] sm:$0xff] }
  0x3e   : > { %440 = vmatpush.msra.mxu1 %v1362_v7  ;;  %376 = vmatpush.msra.mxu0 %v368_v4  ;;  %v360_v17 = vld [vmem:[#allocation5 + $0x90] sm:$0xff]  ;;  %v1383_v18 = vld [vmem:[#allocation7 + $0x48] sm:$0xff]  ;;  %v358_v20 = vld [vmem:[#allocation5 + $0x80] sm:$0xff]  ;;  %vm325_vm1 = vcmp.lt.s32.totalorder %v1458_v58, 15 }
  0x3f   : > { %835 = vmatpush.msra.mxu3 %v366_v8  ;;  %523 = vmatpush.msra.mxu2 %v1365_v9  ;;  %v1386_v19 = vld [vmem:[#allocation5 + $0xa8] sm:$0xff]  ;;  %v1389_v21 = vld [vmem:[#allocation7 + $0x40] sm:$0xff]  ;;  %v1392_v22 = vld [vmem:[#allocation5 + $0x98] sm:$0xff] }
  0x40   : > { %441 = vmatpush.msra.mxu1 %v1368_v10  ;;  %377 = vmatpush.msra.mxu0 %v366_v8  ;;  %v356_v23 = vld [vmem:[#allocation5 + $0x70] sm:$0xff]  ;;  %v1395_v24 = vld [vmem:[#allocation7 + $0x38] sm:$0xff]  ;;  %v1398_v25 = vld [vmem:[#allocation5 + $0x88] sm:$0xff]  ;;  %s686_s11 = scalar_lea.hbm %s1718_s10, %s827_s8 }
  0x41   : > { %836 = vmatpush.msra.mxu3 %v364_v11  ;;  %524 = vmatpush.msra.mxu2 %v1371_v12  ;;  %v354_v26 = vld [vmem:[#allocation5 + $0x60] sm:$0xff]  ;;  %v1401_v27 = vld [vmem:[#allocation7 + $0x30] sm:$0xff]  ;;  %v1404_v28 = vld [vmem:[#allocation5 + $0x78] sm:$0xff]  ;;  %s689_s26 = sshll.u32 %s686_s11, 4  ;;  %s690_s26 = int_to_ptr.hbm [resolvable:$true] %s689_s26 }
  0x42   : > { %442 = vmatpush.msra.mxu1 %v1374_v13  ;;  %378 = vmatpush.msra.mxu0 %v364_v11  ;;  %v352_v29 = vld [vmem:[#allocation5 + $0x50] sm:$0xff]  ;;  %v1407_v30 = vld [vmem:[#allocation7 + $0x28] sm:$0xff]  ;;  %v350_v33 = vld [vmem:[#allocation5 + $0x40] sm:$0xff]  ;;  %s1089_s13 = sshra.s32 %s690_s26, 4  ;;  %s1090_s13 = int_to_ptr.hbm [resolvable:$true] %s1089_s13 }
  0x43   : > { %837 = vmatpush.msra.mxu3 %v362_v14  ;;  %525 = vmatpush.msra.mxu2 %v1377_v15  ;;  %v1410_v32 = vld [vmem:[#allocation5 + $0x68] sm:$0xff]  ;;  %v1413_v34 = vld [vmem:[#allocation7 + $0x20] sm:$0xff]  ;;  %v348_v35 = vld [vmem:[#allocation5 + $0x30] sm:$0xff]  ;;  %s1091_s14 = scalar_lea.hbm %s1090_s13, 256  ;;  %p1096_p10 = scmp.lt.s32.totalorder %s1090_s13, %s1718_s10 }
  0x44   : > { %443 = vmatpush.msra.mxu1 %v1380_v16  ;;  %379 = vmatpush.msra.mxu0 %v362_v14  ;;  %v1416_v36 = vld [vmem:[#allocation5 + $0x58] sm:$0xff]  ;;  %v1422_v38 = vld [vmem:[%s1342_s24] sm:$0xff]  ;;  %v273_v39 = vld [vmem:[%s1342_s24 + $0x8] sm:$0xff]  ;;  %p1092_p1 = scmp.ne.s32.totalorder %s1090_s13, %s1091_s14 }
  0x45   : > { %838 = vmatpush.msra.mxu3 %v360_v17  ;;  %526 = vmatpush.msra.mxu2 %v1383_v18  ;;  %v1419_v37 = vld [vmem:[#allocation7 + $0x18] sm:$0xff]  ;;  %v1428_v41 = vld [vmem:[#allocation5 + $0x48] sm:$0xff]  ;;  %v346_v42 = vld [vmem:[#allocation5 + $0x20] sm:$0xff]  ;;  %v288_v45 = vrot.slane %v1422_v38, 1  ;;  %v289_v46 = vrot.slane %v273_v39, 1 }
  0x46   : > { %444 = vmatpush.msra.mxu1 %v1386_v19  ;;  %380 = vmatpush.msra.mxu0 %v360_v17  ;;  %v1431_v43 = vld [vmem:[#allocation7 + $0x10] sm:$0xff]  ;;  %v1434_v44 = vld [vmem:[#allocation5 + $0x38] sm:$0xff]  ;;  %v1438_v48 = vld [vmem:[#allocation7 + $0x8] sm:$0xff]  ;;  %p1093_p4 = pnand %p1092_p1, %p1310_p5 }
  0x47   : > { %839 = vmatpush.msra.mxu3 %v358_v20  ;;  %527 = vmatpush.msra.mxu2 %v1389_v21  ;;  %v344_v47 = vld [vmem:[#allocation5 + $0x10] sm:$0xff]  ;;  %v347_v49 = vld [vmem:[#allocation5 + $0x28] sm:$0xff]  ;;  %v342_v50 = vld [vmem:[#allocation5] sm:$0xff]  ;;  %v321_v53 = vsel %vm306_vm0, %v288_v45, %v289_v46 }
  0x48   : > { %445 = vmatpush.msra.mxu1 %v1392_v22  ;;  %381 = vmatpush.msra.mxu0 %v358_v20  ;;  %v1443_v51 = vld [vmem:[#allocation7] sm:$0xff]  ;;  %v345_v54 = vld [vmem:[#allocation5 + $0x18] sm:$0xff]  ;;  %v274_v55 = vld [vmem:[%s1342_s24 + $0x10] sm:$0xff]  ;;  %p1094_p8 = pneg %p1093_p4 }
  0x49   : > { %840 = vmatpush.msra.mxu3 %v356_v23  ;;  %528 = vmatpush.msra.mxu2 %v1395_v24  ;;  %v1447_v52 = vld [vmem:[%s1342_s24 + $0x60] sm:$0xff]  ;;  %v343_v56 = vld [vmem:[#allocation5 + $0x8] sm:$0xff]  ;;  %v290_v57 = vrot.slane %v274_v55, 1  ;;  %v275_v61 = vld [vmem:[%s1342_s24 + $0x18] sm:$0xff] }
  0x4a   : > { %446 = vmatpush.msra.mxu1 %v1398_v25  ;;  %382 = vmatpush.msra.mxu0 %v356_v23  ;;  %v1465_v59 = vld [vmem:[%s1342_s24 + $0x68] sm:$0xff]  ;;  %v291_v62 = vrot.slane %v275_v61, 1  ;;  %v1479_v63 = vld [vmem:[%s1342_s24 + $0x70] sm:$0xff]  ;;  %v276_v2 = vld [vmem:[%s1342_s24 + $0x20] sm:$0xff] }
  0x4b   : > { %841 = vmatpush.msra.mxu3 %v354_v26  ;;  %529 = vmatpush.msra.mxu2 %v1401_v27  ;;  %v320_v60 = vsel %vm306_vm0, %v289_v46, %v290_v57  ;;  %v292_v4 = vrot.slane %v276_v2, 1  ;;  %v277_v8 = vld [vmem:[%s1342_s24 + $0x28] sm:$0xff]  ;;  %v279_v17 = vld [vmem:[%s1342_s24 + $0x38] sm:$0xff]  ;;  %v282_v23 = vld [vmem:[%s1342_s24 + $0x50] sm:$0xff] }
  0x4c   : > { %447 = vmatpush.msra.mxu1 %v1404_v28  ;;  %383 = vmatpush.msra.mxu0 %v354_v26  ;;  %v319_v0 = vsel %vm306_vm0, %v290_v57, %v291_v62 }
  0x4d   : > { %842 = vmatpush.msra.mxu3 %v352_v29  ;;  %530 = vmatpush.msra.mxu2 %v1407_v30 }
  0x4e   : > { %448 = vmatpush.msra.mxu1 %v1410_v32  ;;  %384 = vmatpush.msra.mxu0 %v352_v29 }
  0x4f   : > { %843 = vmatpush.msra.mxu3 %v350_v33  ;;  %531 = vmatpush.msra.mxu2 %v1413_v34 }
  0x50   : > { %449 = vmatpush.msra.mxu1 %v1416_v36  ;;  %385 = vmatpush.msra.mxu0 %v350_v33 }
  0x51   : > { %844 = vmatpush.msra.mxu3 %v348_v35  ;;  %532 = vmatpush.msra.mxu2 %v1419_v37 }
  0x52   : > { %450 = vmatpush.msra.mxu1 %v1428_v41  ;;  %386 = vmatpush.msra.mxu0 %v348_v35  ;;  %v601_v35 = vld [vmem:[%s1690_s3] sm:$0x3] }
  0x53   : > { %845 = vmatpush.msra.mxu3 %v346_v42  ;;  %533 = vmatpush.msra.mxu2 %v1431_v43 }
  0x54   : > { %451 = vmatpush.msra.mxu1 %v1434_v44  ;;  %387 = vmatpush.msra.mxu0 %v346_v42 }
  0x55   : > { %846 = vmatpush.msra.mxu3 %v344_v47  ;;  %534 = vmatpush.msra.mxu2 %v1438_v48 }
  0x56   : > { %452 = vmatpush.msra.mxu1 %v347_v49  ;;  %388 = vmatpush.msra.mxu0 %v344_v47 }
  0x57   : > { %847 = vmatpush.msra.mxu3 %v342_v50  ;;  %535 = vmatpush.msra.mxu2 %v1443_v51 }
  0x58   : > { %426 = vmatmul.f32.vlgmr.msra.gmra.mxu3 %v1447_v52  ;;  %536 = vmatmul.f32.vlgmr.msra.gmra.mxu2 %v321_v53 }
  0x59   : > { %848 = vmatpush.msrb.mxu3 %v1359_v6  ;;  %453 = vmatpush.msra.mxu1 %v345_v54  ;;  %v1490_v6 = vld [vmem:[%s1342_s24 + $0x78] sm:$0xff] }
  0x5a   : > { %389 = vmatpush.msra.mxu0 %v342_v50  ;;  %v303_v29 = vrot.slane %v1490_v6, 1 }
  0x5b   : > { %849 = vmatpush.msrb.mxu3 %v1362_v7  ;;  %454 = vmatpush.msra.mxu1 %v343_v56  ;;  %v318_v7 = vsel %vm306_vm0, %v291_v62, %v292_v4 }
  0x5c   : > { %455 = vmatmul.f32.vlgmr.msra.gmra.mxu1 %v1422_v38  ;;  %390 = vmatmul.f32.vlgmr.msra.gmra.mxu0 %v1422_v38 }
  0x5d   : > { %850 = vmatpush.msrb.mxu3 %v1368_v10  ;;  %v293_v10 = vrot.slane %v277_v8, 1 }
  0x5f   : > { %851 = vmatpush.msrb.mxu3 %v1374_v13  ;;  %v317_v11 = vsel %vm306_vm0, %v292_v4, %v293_v10  ;;  %v278_v13 = vld [vmem:[%s1342_s24 + $0x30] sm:$0xff] }
  0x60   : > { %429 = vmatmul.f32.gmra.mxu3 %v1465_v59  ;;  %815 = vmatmul.msk.f32.gmra.mxu2 %vm325_vm1, %v320_v60  ;;  %v294_v14 = vrot.slane %v278_v13, 1 }
  0x61   : > { %852 = vmatpush.msrb.mxu3 %v1380_v16 }
  0x62   : > { %v316_v16 = vsel %vm306_vm0, %v293_v10, %v294_v14 }
  0x63   : > { %853 = vmatpush.msrb.mxu3 %v1386_v19  ;;  %v301_v19 = vrot.slane %v1465_v59, 1 }
  0x64   : > { %458 = vmatmul.f32.gmra.mxu1 %v273_v39  ;;  %393 = vmatmul.f32.gmra.mxu0 %v273_v39  ;;  %v1574_v39 = vperm.slane %v601_v35, 1 }
  0x65   : > { %854 = vmatpush.msrb.mxu3 %v1392_v22 }
  0x67   : > { %855 = vmatpush.msrb.mxu3 %v1398_v25  ;;  %v298_v25 = vrot.slane %v282_v23, 1 }
  0x68   : > { %432 = vmatmul.f32.gmra.mxu3 %v1479_v63  ;;  %542 = vmatmul.f32.gmra.mxu2 %v319_v0 }
  0x69   : > { %856 = vmatpush.msrb.mxu3 %v1404_v28  ;;  %v283_v28 = vld [vmem:[%s1342_s24 + $0x58] sm:$0xff] }
  0x6b   : > { %857 = vmatpush.msrb.mxu3 %v1410_v32 }
  0x6c   : > { %461 = vmatmul.f32.gmra.mxu1 %v274_v55  ;;  %396 = vmatmul.f32.gmra.mxu0 %v274_v55 }
  0x6d   : > { %858 = vmatpush.msrb.mxu3 %v1416_v36  ;;  %v1572_v36 = vperm.slane %v601_v35, 0 }
  0x6f   : > { %859 = vmatpush.msrb.mxu3 %v1428_v41 }
  0x70   : > { %435 = vmatmul.f32.gmra.mxu3 %v1490_v6  ;;  %816 = vmatmul.msk.f32.gmra.mxu2 %vm325_vm1, %v318_v7 }
  0x71   : > { %860 = vmatpush.msrb.mxu3 %v1434_v44 }
  0x73   : > { %861 = vmatpush.msrb.mxu3 %v347_v49 }
  0x74   : > { %464 = vmatmul.f32.gmra.mxu1 %v275_v61  ;;  %399 = vmatmul.f32.gmra.mxu0 %v275_v61 }
  0x75   : > { %862 = vmatpush.msrb.mxu3 %v345_v54 }
  0x77   : > { %863 = vmatpush.msrb.mxu3 %v343_v56 }
  0x78   : > { %491 = vmatmul.f32.vlgmr.msrb.gmra.mxu3 %v1447_v52  ;;  %548 = vmatmul.f32.gmra.mxu2 %v317_v11 }
  0x79   : > { %864 = vmatpush.msra.mxu3 %v1352_v1  ;;  %v295_v1 = vrot.slane %v279_v17, 1 }
  0x7b   : > { %865 = vmatpush.msra.mxu3 %v1355_v3  ;;  %v315_v3 = vsel %vm306_vm0, %v294_v14, %v295_v1 }
  0x7c   : > { %467 = vmatmul.f32.gmra.mxu1 %v276_v2  ;;  %402 = vmatmul.f32.gmra.mxu0 %v276_v2 }
  0x7d   : > { %866 = vmatpush.msra.mxu3 %v1357_v5  ;;  %v280_v5 = vld [vmem:[%s1342_s24 + $0x40] sm:$0xff] }
  0x7f   : > { %867 = vmatpush.msra.mxu3 %v1365_v9  ;;  %v296_v9 = vrot.slane %v280_v5, 1 }
  0x80   : > { %494 = vmatmul.f32.gmra.mxu3 %v1465_v59  ;;  %817 = vmatmul.msk.f32.gmra.mxu2 %vm325_vm1, %v316_v16 }
  0x81   : > { %868 = vmatpush.msra.mxu3 %v1371_v12  ;;  %v314_v12 = vsel %vm306_vm0, %v295_v1, %v296_v9 }
  0x83   : > { %869 = vmatpush.msra.mxu3 %v1377_v15  ;;  %v281_v15 = vld [vmem:[%s1342_s24 + $0x48] sm:$0xff]  ;;  %s1095_s24 = scalar_lea.hbm %s1718_s10, 1024 }
  0x84   : > { %470 = vmatmul.f32.gmra.mxu1 %v277_v8  ;;  %405 = vmatmul.f32.gmra.mxu0 %v277_v8  ;;  %v297_v20 = vrot.slane %v281_v15, 1  ;;  %p1097_p11 = scmp.lt.s32.totalorder %s1095_s24, %s1091_s14 }
  0x85   : > { %870 = vmatpush.msra.mxu3 %v1383_v18  ;;  %v300_v18 = vrot.slane %v1447_v52, 1 }
  0x86   : > { %v312_v26 = vsel %vm306_vm0, %v297_v20, %v298_v25  ;;  %p1098_p12 = por %p1097_p11, %p1096_p10 }
  0x87   : > { %871 = vmatpush.msra.mxu3 %v1389_v21  ;;  %v313_v21 = vsel %vm306_vm0, %v296_v9, %v297_v20  ;;  %v309_v22 = vsel %vm306_vm0, %v300_v18, %v301_v19 }
  0x88   : > { %497 = vmatmul.f32.gmra.mxu3 %v1479_v63  ;;  %554 = vmatmul.f32.gmra.mxu2 %v315_v3  ;;  %p1099_p13 = pnand %p1098_p12, %p1094_p8 }
  0x89   : > { %872 = vmatpush.msra.mxu3 %v1395_v24  ;;  %v302_v24 = vrot.slane %v1479_v63, 1 }
  0x8b   : > { %873 = vmatpush.msra.mxu3 %v1401_v27  ;;  %v308_v27 = vsel %vm306_vm0, %v301_v19, %v302_v24  ;;  %v307_v32 = vsel %vm306_vm0, %v302_v24, %v303_v29 }
  0x8c   : > { %473 = vmatmul.f32.gmra.mxu1 %v278_v13  ;;  %408 = vmatmul.f32.gmra.mxu0 %v278_v13 }
  0x8d   : > { %874 = vmatpush.msra.mxu3 %v1407_v30  ;;  %v299_v30 = vrot.slane %v283_v28, 1 }
  0x8f   : > { %875 = vmatpush.msra.mxu3 %v1413_v34  ;;  %v311_v31 = vsel %vm306_vm0, %v298_v25, %v299_v30  ;;  %v310_v33 = vsel %vm306_vm0, %v299_v30, %v300_v18  ;;  %v322_v34 = vsel %vm306_vm0, %v303_v29, %v288_v45 }
  0x90   : > { %500 = vmatmul.f32.gmra.mxu3 %v1490_v6  ;;  %818 = vmatmul.msk.f32.gmra.mxu2 %vm325_vm1, %v314_v12 }
  0x91   : > { %876 = vmatpush.msra.mxu3 %v1419_v37 }
  0x93   : > { %877 = vmatpush.msra.mxu3 %v1431_v43 }
  0x94   : > { %476 = vmatmul.f32.gmra.mxu1 %v279_v17  ;;  %411 = vmatmul.f32.gmra.mxu0 %v279_v17 }
  0x95   : > { %878 = vmatpush.msra.mxu3 %v1438_v48 }
  0x97   : > { %879 = vmatpush.msra.mxu3 %v1443_v51 }
  0x98   : > { %560 = vmatmul.f32.gmra.mxu2 %v313_v21  ;;  %572 = vmatmul.f32.vlgmr.msra.gmra.mxu3 %v309_v22 }
  0x9c   : > { %479 = vmatmul.f32.gmra.mxu1 %v280_v5  ;;  %414 = vmatmul.f32.gmra.mxu0 %v280_v5 }
  0xa0   : > { %819 = vmatmul.msk.f32.gmra.mxu2 %vm325_vm1, %v312_v26  ;;  %821 = vmatmul.msk.f32.gmra.mxu3 %vm325_vm1, %v308_v27 }
  0xa4   : > { %482 = vmatmul.f32.gmra.mxu1 %v281_v15  ;;  %417 = vmatmul.f32.gmra.mxu0 %v281_v15 }
  0xa8   : > { %566 = vmatmul.f32.gmra.mxu2 %v311_v31  ;;  %578 = vmatmul.f32.gmra.mxu3 %v307_v32 }
  0xac   : > { %485 = vmatmul.f32.gmra.mxu1 %v282_v23  ;;  %420 = vmatmul.f32.gmra.mxu0 %v282_v23 }
  0xb0   : > { %820 = vmatmul.msk.f32.gmra.mxu2 %vm325_vm1, %v310_v33  ;;  %822 = vmatmul.msk.f32.gmra.mxu3 %vm325_vm1, %v322_v34 }
  0xb4   : > { %488 = vmatmul.f32.gmra.mxu1 %v283_v28  ;;  %423 = vmatmul.f32.gmra.mxu0 %v283_v28 }
  0xd9   : > { %v456_v37 = vpop.f32.mrf.mxu1  ;;  %v391_v38 = vpop.f32.mrf.mxu0 }
  0xda   : > { %v607_v40 = vadd.f32 %v1572_v36, %v391_v38 }
  0xdb   : > { %v427_v41 = vpop.f32.mrf.mxu3  ;;  %v537_v42 = vpop.f32.mrf.mxu2 }
  0xdc   : > { %v631_v43 = vadd.f32 %v1572_v36, %v427_v41  ;;  %v585_v44 = vadd.f32 %v537_v42, %v456_v37  ;;  %639 = vst [vmem:[%s1578_s6] sm:$0xff] %v607_v40 }
  0xde   : > { %663 = vst [vmem:[%s1578_s6 + $0xc0] sm:$0xff] %v631_v43  ;;  %v608_v45 = vadd.f32 %v1574_v39, %v585_v44 }
  0xe0   : > { %640 = vst [vmem:[%s1578_s6 + $0x8] sm:$0xff] %v608_v45 }
  0xe1   : > { %v459_v46 = vpop.f32.mrf.mxu1  ;;  %v394_v47 = vpop.f32.mrf.mxu0 }
  0xe2   : > { %v609_v48 = vadd.f32 %v1572_v36, %v394_v47 }
  0xe3   : > { %v430_v49 = vpop.f32.mrf.mxu3  ;;  %v540_v50 = vpop.f32.mrf.mxu2 }
  0xe4   : > { %v633_v51 = vadd.f32 %v1572_v36, %v430_v49  ;;  %v586_v52 = vadd.f32 %v540_v50, %v459_v46  ;;  %641 = vst [vmem:[%s1578_s6 + $0x10] sm:$0xff] %v609_v48 }
  0xe6   : > { %665 = vst [vmem:[%s1578_s6 + $0xd0] sm:$0xff] %v633_v51  ;;  %v610_v53 = vadd.f32 %v1574_v39, %v586_v52 }
  0xe8   : > { %642 = vst [vmem:[%s1578_s6 + $0x18] sm:$0xff] %v610_v53 }
  0xe9   : > { %v462_v54 = vpop.f32.mrf.mxu1  ;;  %v397_v55 = vpop.f32.mrf.mxu0 }
  0xea   : > { %v611_v56 = vadd.f32 %v1572_v36, %v397_v55 }
  0xeb   : > { %v433_v57 = vpop.f32.mrf.mxu3  ;;  %v543_v58 = vpop.f32.mrf.mxu2 }
  0xec   : > { %v635_v59 = vadd.f32 %v1572_v36, %v433_v57  ;;  %v587_v60 = vadd.f32 %v543_v58, %v462_v54  ;;  %643 = vst [vmem:[%s1578_s6 + $0x20] sm:$0xff] %v611_v56 }
  0xee   : > { %667 = vst [vmem:[%s1578_s6 + $0xe0] sm:$0xff] %v635_v59  ;;  %v612_v61 = vadd.f32 %v1574_v39, %v587_v60 }
  0xf0   : > { %644 = vst [vmem:[%s1578_s6 + $0x28] sm:$0xff] %v612_v61 }
  0xf1   : > { %v465_v62 = vpop.f32.mrf.mxu1  ;;  %v400_v63 = vpop.f32.mrf.mxu0 }
  0xf2   : > { %v613_v0 = vadd.f32 %v1572_v36, %v400_v63 }
  0xf3   : > { %v436_v2 = vpop.f32.mrf.mxu3  ;;  %v546_v4 = vpop.f32.mrf.mxu2 }
  0xf4   : > { %v637_v6 = vadd.f32 %v1572_v36, %v436_v2  ;;  %v588_v7 = vadd.f32 %v546_v4, %v465_v62  ;;  %645 = vst [vmem:[%s1578_s6 + $0x30] sm:$0xff] %v613_v0 }
  0xf6   : > { %669 = vst [vmem:[%s1578_s6 + $0xf0] sm:$0xff] %v637_v6  ;;  %v614_v8 = vadd.f32 %v1574_v39, %v588_v7 }
  0xf8   : > { %646 = vst [vmem:[%s1578_s6 + $0x38] sm:$0xff] %v614_v8 }
  0xf9   : > { %v468_v10 = vpop.f32.mrf.mxu1  ;;  %v403_v11 = vpop.f32.mrf.mxu0 }
  0xfa   : > { %v615_v13 = vadd.f32 %v1572_v36, %v403_v11 }
  0xfb   : > { %v492_v14 = vpop.f32.mrf.mxu3  ;;  %v549_v16 = vpop.f32.mrf.mxu2 }
  0xfc   : > { %v589_v17 = vadd.f32 %v549_v16, %v468_v10  ;;  %647 = vst [vmem:[%s1578_s6 + $0x40] sm:$0xff] %v615_v13 }
  0xfe   : > { %v616_v1 = vadd.f32 %v1574_v39, %v589_v17 }
 0x100   : > { %648 = vst [vmem:[%s1578_s6 + $0x48] sm:$0xff] %v616_v1 }
 0x101   : > { %v471_v3 = vpop.f32.mrf.mxu1  ;;  %v406_v5 = vpop.f32.mrf.mxu0 }
 0x102   : > { %v617_v9 = vadd.f32 %v1572_v36, %v406_v5 }
 0x103   : > { %v495_v12 = vpop.f32.mrf.mxu3  ;;  %v552_v15 = vpop.f32.mrf.mxu2 }
 0x104   : > { %v590_v18 = vadd.f32 %v552_v15, %v471_v3  ;;  %649 = vst [vmem:[%s1578_s6 + $0x50] sm:$0xff] %v617_v9 }
 0x106   : > { %v618_v19 = vadd.f32 %v1574_v39, %v590_v18 }
 0x108   : > { %650 = vst [vmem:[%s1578_s6 + $0x58] sm:$0xff] %v618_v19 }
 0x109   : > { %v474_v20 = vpop.f32.mrf.mxu1  ;;  %v409_v21 = vpop.f32.mrf.mxu0 }
 0x10a   : > { %v619_v22 = vadd.f32 %v1572_v36, %v409_v21 }
 0x10b   : > { %v498_v23 = vpop.f32.mrf.mxu3  ;;  %v555_v24 = vpop.f32.mrf.mxu2 }
 0x10c   : > { %v591_v25 = vadd.f32 %v555_v24, %v474_v20  ;;  %651 = vst [vmem:[%s1578_s6 + $0x60] sm:$0xff] %v619_v22 }
 0x10e   : > { %v620_v26 = vadd.f32 %v1574_v39, %v591_v25 }
 0x110   : > { %652 = vst [vmem:[%s1578_s6 + $0x68] sm:$0xff] %v620_v26 }
 0x111   : > { %v477_v27 = vpop.f32.mrf.mxu1  ;;  %v412_v28 = vpop.f32.mrf.mxu0 }
 0x112   : > { %v621_v29 = vadd.f32 %v1572_v36, %v412_v28 }
 0x113   : > { %v501_v30 = vpop.f32.mrf.mxu3  ;;  %v558_v31 = vpop.f32.mrf.mxu2 }
 0x114   : > { %v592_v32 = vadd.f32 %v558_v31, %v477_v27  ;;  %653 = vst [vmem:[%s1578_s6 + $0x70] sm:$0xff] %v621_v29 }
 0x116   : > { %v622_v33 = vadd.f32 %v1574_v39, %v592_v32 }
 0x118   : > { %654 = vst [vmem:[%s1578_s6 + $0x78] sm:$0xff] %v622_v33 }
 0x119   : > { %v480_v34 = vpop.f32.mrf.mxu1  ;;  %v415_v35 = vpop.f32.mrf.mxu0 }
 0x11a   : > { %v623_v37 = vadd.f32 %v1572_v36, %v415_v35 }
 0x11b   : > { %v561_v38 = vpop.f32.mrf.mxu2  ;;  %v573_v40 = vpop.f32.mrf.mxu3 }
 0x11c   : > { %v593_v41 = vadd.f32 %v561_v38, %v480_v34  ;;  %v597_v42 = vadd.f32 %v573_v40, %v492_v14  ;;  %655 = vst [vmem:[%s1578_s6 + $0x80] sm:$0xff] %v623_v37 }
 0x11e   : > { %v624_v43 = vadd.f32 %v1574_v39, %v593_v41  ;;  %v632_v44 = vadd.f32 %v1574_v39, %v597_v42 }
 0x120   : > { %656 = vst [vmem:[%s1578_s6 + $0x88] sm:$0xff] %v624_v43 }
 0x121   : > { %664 = vst [vmem:[%s1578_s6 + $0xc8] sm:$0xff] %v632_v44  ;;  %v483_v45 = vpop.f32.mrf.mxu1  ;;  %v418_v46 = vpop.f32.mrf.mxu0 }
 0x122   : > { %v625_v47 = vadd.f32 %v1572_v36, %v418_v46 }
 0x123   : > { %v564_v48 = vpop.f32.mrf.mxu2  ;;  %v576_v49 = vpop.f32.mrf.mxu3 }
 0x124   : > { %v594_v50 = vadd.f32 %v564_v48, %v483_v45  ;;  %v598_v51 = vadd.f32 %v576_v49, %v495_v12  ;;  %657 = vst [vmem:[%s1578_s6 + $0x90] sm:$0xff] %v625_v47 }
 0x126   : > { %v626_v52 = vadd.f32 %v1574_v39, %v594_v50  ;;  %v634_v53 = vadd.f32 %v1574_v39, %v598_v51 }
 0x128   : > { %658 = vst [vmem:[%s1578_s6 + $0x98] sm:$0xff] %v626_v52 }
 0x129   : > { %666 = vst [vmem:[%s1578_s6 + $0xd8] sm:$0xff] %v634_v53  ;;  %v486_v54 = vpop.f32.mrf.mxu1  ;;  %v421_v55 = vpop.f32.mrf.mxu0 }
 0x12a   : > { %v627_v56 = vadd.f32 %v1572_v36, %v421_v55 }
 0x12b   : > { %v567_v57 = vpop.f32.mrf.mxu2  ;;  %v579_v58 = vpop.f32.mrf.mxu3 }
 0x12c   : > { %v595_v59 = vadd.f32 %v567_v57, %v486_v54  ;;  %v599_v60 = vadd.f32 %v579_v58, %v498_v23  ;;  %659 = vst [vmem:[%s1578_s6 + $0xa0] sm:$0xff] %v627_v56 }
 0x12e   : > { %v628_v61 = vadd.f32 %v1574_v39, %v595_v59  ;;  %v636_v62 = vadd.f32 %v1574_v39, %v599_v60 }
 0x130   : > { %660 = vst [vmem:[%s1578_s6 + $0xa8] sm:$0xff] %v628_v61 }
 0x131   : > { %668 = vst [vmem:[%s1578_s6 + $0xe8] sm:$0xff] %v636_v62  ;;  %v489_v63 = vpop.f32.mrf.mxu1  ;;  %v424_v0 = vpop.f32.mrf.mxu0 }
 0x132   : > { %v629_v2 = vadd.f32 %v1572_v36, %v424_v0 }
 0x133   : > { %v570_v4 = vpop.f32.mrf.mxu2  ;;  %v582_v6 = vpop.f32.mrf.mxu3 }
 0x134   : > { %v596_v7 = vadd.f32 %v570_v4, %v489_v63  ;;  %v600_v8 = vadd.f32 %v582_v6, %v501_v30  ;;  %661 = vst [vmem:[%s1578_s6 + $0xb0] sm:$0xff] %v629_v2 }
 0x136   : > { %v630_v10 = vadd.f32 %v1574_v39, %v596_v7  ;;  %v638_v11 = vadd.f32 %v1574_v39, %v600_v8 }
 0x138   : > { %662 = vst [vmem:[%s1578_s6 + $0xb8] sm:$0xff] %v630_v10 }
 0x139   : > { %670 = vst [vmem:[%s1578_s6 + $0xf8] sm:$0xff] %v638_v11 }
 0x13a   : > { %1102 = shalt.err (!%p1099_p13)
}
 0x13b   : > { %s1185_s1 = smov 256   ;;  %s1186_s27 = smov 16  }
 0x13c   : > { %890 = dma.vmem_to_hbm [thread:$0]  (%p1310_p5), %s688_s12, 4096, %s690_s26, %s672_s5, %s1185_s1, %s1185_s1, %s1186_s27  }
 0x13d PF: > { %s1720_s6 = sld [smem:[#allocation12_spill]]  ;;  %p912_p0 = scmp.ge.s32.totalorder %s1177_s22, 2 }
 0x13f   : > { %p904_p3 = pnand %p912_p0, %p1271_p6 }
 0x141   : > { %p905_p7 = pneg %p904_p3 }
 0x143   : > { %s704_s30 = sand.u32 1, %s1720_s6  }
 0x144   : > { %s705_s9 = scalar_lea.sflag [#allocation4], %s704_s30 }
 0x145   : > { %1144 = dma.done.wait (%p905_p7), %s705_s9, 4096  }
 0x146   : > { %1146 = vsyncadd (%p905_p7), %s705_s9, 4294963200  ;;  %s21_s22 = sadd.s32 1, %s1177_s22   ;;  %s1722_s8 = sld [smem:[#allocation14_spill]] }
 0x147   : > { %p18_p9 = scmp.ge.s32.totalorder %s21_s22, 6   ;;  %s1723_s15 = smov %s1153_s16 }
 0x148   : > { %s1724_s16 = smov %s1157_s17  ;;  %s1725_s17 = smov %s1323_s2 }
 0x149   : > { %s1726_s18 = smov %s1169_s20  ;;  %s1727_s19 = smov %s1173_s21 }
 0x14a   : > { %s1729_s21 = smov %s1735_s7  ;;  %20 = sbr.rel (!%p18_p9) target bundleno = 12 (0xc), region = 89 }
 0x14c   : > { %s1728_s20 = smov %s1722_s8 }
 0x14f   :  { %711 = vsyncpa [#allocation3], 1 }
 0x150   :  { %713 = vsyncpa [#allocation3 + $0x1], 1 }
 0x151   :  { %714 = vsyncpa [#allocation6], 1 }
 0x152   :  { %715 = vsyncpa [#allocation4], 1 }
 0x153   :  { %717 = vsyncpa [#allocation4 + $0x1], 1 }

</bundles_post_ra>
